<compile_context>
chip_gen: v7x
topology: tpu7x:2x2x1
jax: 0.10.0
libtpu: 0.0.40
codegen_flags: <defaults>
</compile_context>

<pallas_src>
import functools

import jax
import jax.numpy as jnp
from jax.experimental import pallas as pl
from jax.experimental.pallas import tpu as pltpu


def _round_up(x: int, m: int) -> int:
    return ((x + m - 1) // m) * m


def dqn_policy_kernel(x_ref, w1_ref, b1_ref, w2_ref, b2_ref, o_ref):
    """One batch tile: o = relu(x @ W1 + b1) @ W2 + b2 (f32 accumulation)."""
    x = x_ref[...]
    # Hidden layer: MXU matmul (f32 accumulator) + VPU bias/ReLU in f32.
    h = jnp.dot(x.astype(w1_ref.dtype), w1_ref[...],
                preferred_element_type=jnp.float32)
    h = jnp.maximum(h + b1_ref[...].astype(jnp.float32), 0.0)  # f32 elementwise (v5e-safe)
    # Output layer: cast only at the MXU input, accumulate in f32.
    q = jnp.dot(h.astype(w2_ref.dtype), w2_ref[...],
                preferred_element_type=jnp.float32)
    q = q + b2_ref[...].astype(jnp.float32)
    o_ref[...] = q.astype(o_ref.dtype)   # [bm, action_dim] store, no lane padding


def prepare_params(w1, b1, w2, b2, *, param_dtype=jnp.bfloat16):
    """One-time parameter prep (hoisted out of the forward hot path).

    Weights are cast to the MXU-input dtype (bf16 recommended on all
    generations); biases stay f32 since they feed the f32 elementwise path.
    """
    return (w1.astype(param_dtype), b1.astype(jnp.float32),
            w2.astype(param_dtype), b2.astype(jnp.float32))


def dqn_policy_forward(state, w1, b1, w2, b2, *, block_b: int = 2048):
    """state: [B, state_dim] f32 -> Q-values [B, action_dim] f32.

    block_b: max batch rows per grid step (multiple of 8).  For batches that
    fit in one tile we still split into (up to) two tiles so both v7x
    TensorCores get work; very small batches (<16 rows) use a single tile.
    """
    B, state_dim = state.shape
    hidden_dim = w1.shape[1]
    action_dim = w2.shape[1]

    # Batch tile: multiple of 8 (sublane) or equal to the full batch dim.
    if B <= block_b:
        bm = _round_up(pl.cdiv(B, 2), 8) if B >= 16 else B
    else:
        bm = _round_up(block_b, 8)
    grid = (pl.cdiv(B, bm),)

    w_bytes = (w1.size * w1.dtype.itemsize + w2.size * w2.dtype.itemsize
               + b1.size * b1.dtype.itemsize + b2.size * b2.dtype.itemsize)
    cost = pl.CostEstimate(
        flops=2 * B * (state_dim * hidden_dim + hidden_dim * action_dim),
        transcendentals=0,
        bytes_accessed=(B * state_dim * state.dtype.itemsize
                        + B * action_dim * 4 + w_bytes))

    return pl.pallas_call(
        dqn_policy_kernel,
        out_shape=jax.ShapeDtypeStruct((B, action_dim), jnp.float32),
        grid=grid,
        in_specs=[
            # Batch-tiled activations (last dim == full array dim).
            pl.BlockSpec((bm, state_dim), lambda i: (i, 0)),
            # Weights/biases: full-array blocks with constant index_map ->
            # resident in VMEM across all batch tiles (no re-DMA per tile).
            pl.BlockSpec((state_dim, hidden_dim), lambda i: (0, 0)),
            pl.BlockSpec((1, hidden_dim), lambda i: (0, 0)),
            pl.BlockSpec((hidden_dim, action_dim), lambda i: (0, 0)),
            pl.BlockSpec((1, action_dim), lambda i: (0, 0)),
        ],
        out_specs=pl.BlockSpec((bm, action_dim), lambda i: (i, 0)),
        compiler_params=pltpu.CompilerParams(
            dimension_semantics=("parallel",)),   # batch tiles split across TCs (v7x)
        cost_estimate=cost,
    )(state, w1, b1, w2, b2)


def init_params(key, state_dim, hidden_dim, action_dim):
    """Deterministic init mimicking torch.nn.Linear default U[-1/sqrt(fan_in), +...]."""
    k1, k2, k3, k4 = jax.random.split(key, 4)
    lim1 = 1.0 / jnp.sqrt(jnp.float32(state_dim))
    lim2 = 1.0 / jnp.sqrt(jnp.float32(hidden_dim))
    w1 = jax.random.uniform(k1, (state_dim, hidden_dim), jnp.float32, -lim1, lim1)
    b1 = jax.random.uniform(k2, (1, hidden_dim), jnp.float32, -lim1, lim1)
    w2 = jax.random.uniform(k3, (hidden_dim, action_dim), jnp.float32, -lim2, lim2)
    b2 = jax.random.uniform(k4, (1, action_dim), jnp.float32, -lim2, lim2)
    return w1, b1, w2, b2


if __name__ == "__main__":
    # Shapes implied by the module: DQN_policy(state_dim=4, hidden_dim=32, action_dim=8)
    state_dim, hidden_dim, action_dim = 4, 32, 8

    key = jax.random.PRNGKey(0)
    k_state1, k_state2, k_params = jax.random.split(key, 3)
    w1, b1, w2, b2 = init_params(k_params, state_dim, hidden_dim, action_dim)

    fwd = jax.jit(functools.partial(dqn_policy_forward, block_b=2048))

    # --- Test 1: tiny batch (single tile, full-dim blocks), f32 params, strict check.
    batch1 = 2
    state1 = jax.random.normal(k_state1, (batch1, state_dim), jnp.float32)
    p32 = prepare_params(w1, b1, w2, b2, param_dtype=jnp.float32)
    q1 = jax.block_until_ready(fwd(state1, *p32))
    ref1 = jnp.maximum(state1 @ w1 + b1, 0.0) @ w2 + b2
    assert q1.shape == (batch1, action_dim)
    assert jnp.allclose(q1, ref1, atol=1e-4, rtol=1e-4)

    # --- Test 2: multi-tile batch with a partial last block, bf16 MXU inputs.
    batch2 = 37
    state2 = jax.random.normal(k_state2, (batch2, state_dim), jnp.float32)
    pbf16 = prepare_params(w1, b1, w2, b2, param_dtype=jnp.bfloat16)
    q2 = jax.block_until_ready(fwd(state2, *pbf16))
    ref2 = jnp.maximum(state2 @ w1 + b1, 0.0) @ w2 + b2
    assert q2.shape == (batch2, action_dim)
    assert jnp.allclose(q2, ref2, atol=3e-2, rtol=3e-2)   # bf16 activation/weight error

    print("KERNEL_OK")
</pallas_src>

<mosaic_0001>
module attributes {stable_mosaic.version = 11 : i64} {
  func.func @dqn_policy_kernel(%arg0: i32, %arg1: memref<2x4xf32, #tpu.memory_space<vmem>>, %arg2: memref<4x32xf32, #tpu.memory_space<vmem>>, %arg3: memref<1x32xf32, #tpu.memory_space<vmem>>, %arg4: memref<32x8xf32, #tpu.memory_space<vmem>>, %arg5: memref<1x8xf32, #tpu.memory_space<vmem>>, %arg6: memref<2x8xf32, #tpu.memory_space<vmem>>) attributes {dimension_semantics = [#tpu.dimension_semantics<parallel>], iteration_bounds = array<i64: 1>, scalar_prefetch = 0 : i64, scratch_operands = 0 : i64, tpu.core_type = #tpu.core_type<tc>, window_params = [{transform_indices = @transform_0, window_bounds = array<i64: 2, 4>}, {pipeline_mode = #tpu.pipeline_mode<synchronous>, transform_indices = @transform_1, window_bounds = array<i64: 4, 32>}, {pipeline_mode = #tpu.pipeline_mode<synchronous>, transform_indices = @transform_2, window_bounds = array<i64: 1, 32>}, {pipeline_mode = #tpu.pipeline_mode<synchronous>, transform_indices = @transform_3, window_bounds = array<i64: 32, 8>}, {pipeline_mode = #tpu.pipeline_mode<synchronous>, transform_indices = @transform_4, window_bounds = array<i64: 1, 8>}, {transform_indices = @transform_5, window_bounds = array<i64: 2, 8>}]} {
    %c0 = arith.constant 0 : index
    %c0_0 = arith.constant 0 : index
    %0 = vector.load %arg1[%c0, %c0_0] : memref<2x4xf32, #tpu.memory_space<vmem>>, vector<2x4xf32>
    %c0_1 = arith.constant 0 : index
    %c0_2 = arith.constant 0 : index
    %1 = vector.load %arg2[%c0_1, %c0_2] : memref<4x32xf32, #tpu.memory_space<vmem>>, vector<4x32xf32>
    %cst = arith.constant dense<0.000000e+00> : vector<2x32xf32>
    %2 = tpu.matmul %0, %1, %cst {dimension_numbers = #tpu.dot_dimension_numbers<[1], [0], [0], [1], [0, 0, 1, 1], [], []>} : vector<2x4xf32>, vector<4x32xf32>, vector<2x32xf32> -> vector<2x32xf32>
    %c0_3 = arith.constant 0 : index
    %c0_4 = arith.constant 0 : index
    %3 = vector.load %arg3[%c0_3, %c0_4] : memref<1x32xf32, #tpu.memory_space<vmem>>, vector<1x32xf32>
    %4 = vector.broadcast %3 : vector<1x32xf32> to vector<2x32xf32>
    %5 = arith.addf %2, %4 : vector<2x32xf32>
    %cst_5 = arith.constant 0.000000e+00 : f32
    %6 = vector.broadcast %cst_5 : f32 to vector<2x32xf32>
    %7 = arith.maximumf %5, %6 : vector<2x32xf32>
    %c0_6 = arith.constant 0 : index
    %c0_7 = arith.constant 0 : index
    %8 = vector.load %arg4[%c0_6, %c0_7] : memref<32x8xf32, #tpu.memory_space<vmem>>, vector<32x8xf32>
    %cst_8 = arith.constant dense<0.000000e+00> : vector<2x8xf32>
    %9 = tpu.matmul %7, %8, %cst_8 {dimension_numbers = #tpu.dot_dimension_numbers<[1], [0], [0], [1], [0, 0, 1, 1], [], []>} : vector<2x32xf32>, vector<32x8xf32>, vector<2x8xf32> -> vector<2x8xf32>
    %c0_9 = arith.constant 0 : index
    %c0_10 = arith.constant 0 : index
    %10 = vector.load %arg5[%c0_9, %c0_10] : memref<1x8xf32, #tpu.memory_space<vmem>>, vector<1x8xf32>
    %11 = vector.broadcast %10 : vector<1x8xf32> to vector<2x8xf32>
    %12 = arith.addf %9, %11 : vector<2x8xf32>
    %c0_11 = arith.constant 0 : index
    %c0_12 = arith.constant 0 : index
    %13 = vector.load %arg6[%c0_11, %c0_12] : memref<2x8xf32, #tpu.memory_space<vmem>>, vector<2x8xf32>
    tpu.vector_store %arg6[%c0_11, %c0_12], %12 {strides = array<i32>} : memref<2x8xf32, #tpu.memory_space<vmem>>, vector<2x8xf32>,
    return
  }
  func.func @transform_0(%arg0: i32) -> (i32, i32) {
    %c0_i32 = arith.constant 0 : i32
    %c0_i32_0 = arith.constant 0 : i32
    return %arg0, %c0_i32 : i32, i32
  }
  func.func @transform_1(%arg0: i32) -> (i32, i32) {
    %c0_i32 = arith.constant 0 : i32
    %c0_i32_0 = arith.constant 0 : i32
    %c0_i32_1 = arith.constant 0 : i32
    return %c0_i32, %c0_i32_0 : i32, i32
  }
  func.func @transform_2(%arg0: i32) -> (i32, i32) {
    %c0_i32 = arith.constant 0 : i32
    %c0_i32_0 = arith.constant 0 : i32
    %c0_i32_1 = arith.constant 0 : i32
    return %c0_i32, %c0_i32_0 : i32, i32
  }
  func.func @transform_3(%arg0: i32) -> (i32, i32) {
    %c0_i32 = arith.constant 0 : i32
    %c0_i32_0 = arith.constant 0 : i32
    %c0_i32_1 = arith.constant 0 : i32
    return %c0_i32, %c0_i32_0 : i32, i32
  }
  func.func @transform_4(%arg0: i32) -> (i32, i32) {
    %c0_i32 = arith.constant 0 : i32
    %c0_i32_0 = arith.constant 0 : i32
    %c0_i32_1 = arith.constant 0 : i32
    return %c0_i32, %c0_i32_0 : i32, i32
  }
  func.func @transform_5(%arg0: i32) -> (i32, i32) {
    %c0_i32 = arith.constant 0 : i32
    %c0_i32_0 = arith.constant 0 : i32
    return %arg0, %c0_i32 : i32, i32
  }
}

</mosaic_0001>

<bundles_post_ra>
// kernel: dqn_policy_forward.1
= control target key start
LH: loop header
LB: loop body
LE: loop exit
PB: predicated region body
PF: predicated region fallthrough
CT: control target
= control target key end

     0   :  { %vm34_vm0 = vcmask 1043456   ;;  %vm30_vm1 = vcmask 31744   ;;  %v272_v1 = vmov 0.0   ;;  %vm273_vm2 = vmmov 0   ;;  %s342_s0 = inlined_call_operand.vmem [shape: f32[2,4], index: 0, kind: input, shape index: {}]   ;;  %s343_s1 = inlined_call_operand.vmem [shape: f32[4,32], index: 1, kind: input, shape index: {}]   ;;  %s344_s2 = inlined_call_operand.vmem [shape: f32[1,32], index: 2, kind: input, shape index: {}]   ;;  %s345_s3 = inlined_call_operand.vmem [shape: f32[32,8], index: 3, kind: input, shape index: {}]   ;;  %s346_s4 = inlined_call_operand.vmem [shape: f32[1,8], index: 4, kind: input, shape index: {}]   ;;  %s347_s5 = inlined_call_operand.hbm [shape: f32[2,8], index: 5, kind: output, shape index: {}]  }
   0x1   :  { %v22_v0 = vld [vmem:[%s343_s1] sm:$0xf]  ;;  %222 = vmatprep.subr.mxu0 %v272_v1  ;;  %224 = vmatprep.mubr.msk.f32.mxu0 %vm273_vm2, %v272_v1  ;;  %v110_v4 = vld [vmem:[%s345_s3 + $0x8] sm:$0xff]  ;;  %v274_v5 = vmov 0.0|0.0  }
   0x2   :  { %v21_v2 = vld [vmem:[%s342_s0] sm:$0x3]  ;;  %223 = vmatpush3.msk.msra.mxu0 %vm34_vm0, %v22_v0  ;;  %238 = vmatprep.subr.bf16.mxu1 %v274_v5 }
   0x3   :  { %v109_v3 = vld [vmem:[%s345_s3] sm:$0xff] }
   0x4   :  { %v239_v6 = vpack.c.bf16 %v110_v4, %v109_v3 }
   0x5   :  { %10 = vsyncpa [#allocation3], 0  ;;  %225 = vmatmul.mubr.msk.f32.vlgmr.msra.gmra.mrb[0].mxu0 %vm30_vm1, %v21_v2  ;;  %235 = vmatprep.mubr.msk.f32.mxu1 %vm273_vm2, %v272_v1  ;;  %v111_v7 = vld [vmem:[%s345_s3 + $0x10] sm:$0xff]  ;;  %v112_v8 = vld [vmem:[%s345_s3 + $0x18] sm:$0xff]  ;;  %vm120_vm3 = vcmask 261120   ;;  %s275_s7 = smov [#allocation2]  }
   0x6   :  { %240 = vmatpush3.bf16.msra.mxu1 %v239_v6  ;;  %v242_v9 = vpack.c.bf16 %v112_v8, %v111_v7  ;;  %v210_v10 = vld [vmem:[%s344_s2] ss:$0 sm:$0xff]  ;;  %s202_s8 = sshll.u32 %s275_s7, 4  ;;  %vm194_vm4 = vcmask 58368   ;;  %s203_s8 = int_to_ptr.vmem [resolvable:$true] %s202_s8 }
   0x7   :  { %241 = vmatprep.subr.bf16.mxu1 %v274_v5  ;;  %v213_v15 = vld [vmem:[%s346_s4] ss:$0 sm:$0xff]  ;;  %s248_s3 = scalar_lea.vmem %s203_s8, 32  ;;  %p253_p1 = scmp.lt.s32.totalorder %s203_s8, %s203_s8 }
   0x8   :  { %p249_p0 = scmp.ne.s32.totalorder %s203_s8, %s248_s3  ;;  %p254_p2 = scmp.lt.s32.totalorder %s248_s3, %s248_s3 }
   0xa   :  { %243 = vmatpush3.bf16.msra.mxu1 %v242_v9  ;;  %p255_p3 = por %p254_p2, %p253_p1 }
   0xc   :  { %p256_p4 = pnand %p255_p3, %p249_p0 }
  0xd8   :  { %v104_v11 = vpop.f32.mrb[0].mxu0 }
  0xd9   :  { %v105_v12 = vadd.f32 %v210_v10, %v104_v11  ;;  %v226_v13 = vpop.f32.mrb[1].mxu0 }
  0xdb   :  { %v108_v14 = vmax.f32 %v105_v12, 0.0 }
  0xdd   :  { %236 = vmatmul.mubr.msk.f32.vlgmr.msra.gmra.mrb[0].mxu1 %vm120_vm3, %v108_v14 }
 0x1b0   :  { %v190_v16 = vpop.f32.mrb[0].mxu1 }
 0x1b1   :  { %v191_v17 = vadd.f32 %v213_v15, %v190_v16  ;;  %v237_v18 = vpop.f32.mrb[1].mxu1 }
 0x1b3   :  { %195 = vst.msk [vmem:[#allocation2] sm:$0x3] %vm194_vm4, %v191_v17 }
 0x1b4   :  { %259 = shalt.err (!%p256_p4)
}
 0x1b5   :  { %s260_s10 = scalar_lea.hbm %s347_s5, 32 }
 0x1b6   :  { %p261_p5 = scmp.ne.s32.totalorder %s347_s5, %s260_s10  ;;  %p264_p6 = scmp.lt.u32.totalorder %s260_s10, %s347_s5 }
 0x1b8   :  { %p266_p7 = pnand %p264_p6, %p261_p5 }
 0x1ba   :  { %269 = shalt.err (!%p266_p7)
}
 0x1bb   :  { %205 = dma.vmem_to_hbm [thread:$0]  %s203_s8, 32, %s347_s5, [#allocation3]  }
 0x1bc   :  { %270 = dma.done.wait [#allocation3], 32  }
 0x1bd   :  { %271 = vsyncadd [#allocation3], 4294967264 }
 0x1be   :  { %209 = vsyncpa [#allocation3], 1 }

</bundles_post_ra>
